<compile_context>
chip_gen: v7x
topology: tpu7x:2x2x1
jax: 0.10.0
libtpu: 0.0.40
codegen_flags: <defaults>
</compile_context>

<pallas_src>
import numpy as np
import jax
import jax.numpy as jnp
from jax import lax
from jax.experimental import pallas as pl
from jax.experimental.pallas import tpu as pltpu


def _round_up(x, m):
    return -(-x // m) * m


def _full_spec(shape):
    """Whole-array block (single grid step)."""
    zeros = (0,) * len(shape)
    return pl.BlockSpec(shape, lambda i: zeros)


# ----------------------------------------------------------------------------
# Device portion: ONE fused Pallas kernel inside one jit.
# ----------------------------------------------------------------------------

@jax.jit
def device_forward(KUU_adj, VUU_adj, Vuser, Vitem, Kuser, Kitem,
                   preference, Vpreference, structure):
    f32 = jnp.float32
    Vuser = jnp.asarray(Vuser, f32)
    Vitem = jnp.asarray(Vitem, f32)
    Kuser = jnp.asarray(Kuser, f32)
    Kitem = jnp.asarray(Kitem, f32)
    VUU = jnp.asarray(VUU_adj, f32)
    KUU = jnp.asarray(KUU_adj, f32)
    VUI = jnp.asarray(Vpreference, f32).T             # (Nv, NiV)
    KUI = jnp.asarray(preference, f32).T              # (nKi, NiK), nKi == 5
    struct = jnp.asarray(structure, f32)

    Nv, D = Vuser.shape
    NiV = Vitem.shape[0]
    Nk = Kuser.shape[0]
    NiK = Kitem.shape[0]
    nKi = KUI.shape[0]

    # --- batch all five A @ B^T products into one MXU matmul ----------------
    lhs = jnp.concatenate([Vuser, Kuser, Kitem], axis=0)          # (L, D)
    L = Nv + Nk + NiK
    Lp = _round_up(L, 8)
    lhs = jnp.pad(lhs, ((0, Lp - L), (0, 0)))

    rhs = jnp.concatenate([Vitem, Vuser, Kuser, Kitem], axis=0)   # (R, D)
    R = NiV + Nv + Nk + NiK
    Rp = max(128, _round_up(R, 128))                              # lane-dense sims
    rhs = jnp.pad(rhs, ((0, Rp - R), (0, 0)))

    nKi_p = _round_up(nKi, 8)                                     # pad 5 -> 8 rows
    KUI_p = jnp.pad(KUI, ((0, nKi_p - nKi), (0, 0)))
    struct_trim = struct[:, :NiV]                                 # (NiK, NiV)

    kitem_row = Nv + Nk            # Kitem rows inside lhs (sublane-aligned here)

    def kernel(lhs_ref, rhs_ref, vuu_ref, kuu_ref, vui_ref, kui_ref, st_ref,
               sims_ref, t1_ref, t2_ref, t3_ref, t4_ref, ii_ref):
        # All five similarity matrices in a single MXU product.
        sims = lax.dot_general(lhs_ref[...], rhs_ref[...],
                               dimension_numbers=(((1,), (1,)), ((), ())),
                               preferred_element_type=jnp.float32)
        sims_ref[...] = sims

        def one_minus_bin_minus_eye(a):                # 1 - (a > 0) - I
            b = jnp.where(a > 0, jnp.float32(1.0), jnp.float32(0.0))
            r = lax.broadcasted_iota(jnp.int32, a.shape, 0)
            c = lax.broadcasted_iota(jnp.int32, a.shape, 1)
            eye = jnp.where(r == c, jnp.float32(1.0), jnp.float32(0.0))
            return jnp.float32(1.0) - b - eye

        t1_ref[...] = one_minus_bin_minus_eye(vuu_ref[...])       # tmp1
        t2_ref[...] = one_minus_bin_minus_eye(kuu_ref[...])       # tmp2 (full)
        t3_ref[...] = jnp.float32(1.0) - vui_ref[...]             # tmp3
        t4_ref[...] = jnp.float32(1.0) - kui_ref[...]             # tmp4 (row-padded)

        # ii = mean(|Kitem @ Vitem^T - structure[:, :NiV]|); the Kitem block of
        # sims is sliced in-kernel (rows kitem_row:kitem_row+NiK, cols 0:NiV).
        ii_adj = sims[kitem_row:kitem_row + NiK, 0:NiV]
        d = jnp.abs(ii_adj - st_ref[...])
        m = jnp.mean(d, axis=(0, 1), keepdims=True)               # (1, 1)
        # broadcast to a full (8, 128) tile -> unmasked lane-dense store
        ii_ref[...] = jnp.broadcast_to(m, ii_ref.shape)

    n_flops = 2 * Lp * Rp * D
    bytes_io = 4 * (Lp * D + Rp * D + Nv * Nv + Nk * Nk + Nv * NiV
                    + nKi_p * NiK + NiK * NiV
                    + Lp * Rp + Nv * Nv + Nk * Nk + Nv * NiV + nKi_p * NiK
                    + 8 * 128)

    sims, tmp1, tmp2, tmp3, tmp4_p, ii_tile = pl.pallas_call(
        kernel,
        out_shape=(
            jax.ShapeDtypeStruct((Lp, Rp), f32),       # sims (all 5 products)
            jax.ShapeDtypeStruct((Nv, Nv), f32),       # tmp1
            jax.ShapeDtypeStruct((Nk, Nk), f32),       # tmp2
            jax.ShapeDtypeStruct((Nv, NiV), f32),      # tmp3
            jax.ShapeDtypeStruct((nKi_p, NiK), f32),   # tmp4 (row-padded)
            jax.ShapeDtypeStruct((8, 128), f32),       # ii broadcast tile
        ),
        grid=(1,),
        in_specs=[_full_spec((Lp, D)), _full_spec((Rp, D)),
                  _full_spec((Nv, Nv)), _full_spec((Nk, Nk)),
                  _full_spec((Nv, NiV)), _full_spec((nKi_p, NiK)),
                  _full_spec((NiK, NiV))],
        out_specs=[_full_spec((Lp, Rp)), _full_spec((Nv, Nv)),
                   _full_spec((Nk, Nk)), _full_spec((Nv, NiV)),
                   _full_spec((nKi_p, NiK)), _full_spec((8, 128))],
        cost_estimate=pl.CostEstimate(flops=n_flops, transcendentals=0,
                                      bytes_accessed=bytes_io),
        compiler_params=pltpu.CompilerParams(dimension_semantics=("arbitrary",)),
    )(lhs, rhs, VUU, KUU, VUI, KUI_p, struct_trim)

    return {
        "sims": sims,
        "tmp1": tmp1,
        "tmp2": tmp2,
        "tmp3": tmp3,
        "tmp4_padded": tmp4_p,
        "ii": ii_tile[0, 0],
        # pass-throughs the host sampling loops need, bundled so that ONE
        # jax.device_get is the only device->host sync of the whole forward
        "VUU_adj": VUU,
        "KUU_adj": KUU,
        "VUI_adj": VUI,
        "KUI_adj": KUI,
    }


# ----------------------------------------------------------------------------
# Host portion: data-dependent sort / weighted sampling / gather (numpy).
# ----------------------------------------------------------------------------

def contrast_loss(padj, nadj, px, nx, seed=0):
    # TODO(synk): torch.multinomial's RNG stream cannot be bit-matched; a
    # deterministic numpy Generator with identical weighted-with-replacement
    # sampling semantics is used instead.
    padj = np.asarray(padj, np.float32)
    nadj = np.asarray(nadj, np.float32)
    px = np.asarray(px, np.float32)
    nx = np.asarray(nx, np.float32)

    pcnt = (padj > 0).sum(axis=1).astype(np.int64)
    ncnt = (nadj > 0).sum(axis=1).astype(np.int64)

    pinc = np.argsort(padj, axis=1, kind="stable")    # torch.sort ascending
    pval = np.take_along_axis(padj, pinc, axis=1)
    ninc = np.argsort(nadj, axis=1, kind="stable")
    nval = np.take_along_axis(nadj, ninc, axis=1)

    rng = np.random.default_rng(seed)
    loss = 0.0
    for i in range(pcnt.shape[0]):
        num = int(min(pcnt[i], ncnt[i]))
        if num <= 0:
            continue
        assert num <= pcnt[i] and num <= ncnt[i]
        if num == pcnt[i]:
            w = nval[i, nadj.shape[1] - ncnt[i]:]
            idx = rng.choice(int(ncnt[i]), size=num, replace=True,
                             p=w / w.sum()) - int(ncnt[i])
            n_sel = nx[i, ninc[i, idx]]
            p_sel = px[i, pinc[i, padj.shape[1] - num:]]
        else:
            w = pval[i, padj.shape[1] - pcnt[i]:]
            idx = rng.choice(int(pcnt[i]), size=num, replace=True,
                             p=w / w.sum()) - int(pcnt[i])
            n_sel = nx[i, ninc[i, nadj.shape[1] - num:]]
            p_sel = px[i, pinc[i, idx]]
        loss += float(np.clip(n_sel - p_sel + 1.0, 0.0, None).mean())
    return loss


def host_losses(host, seed=0):
    """Finalize Pretrain_loss_train.forward from the fused kernel's outputs
    (host = jax.device_get(device_forward(...)))."""
    sims = host["sims"]
    tmp1, tmp2 = host["tmp1"], host["tmp2"]
    tmp3, tmp4_p = host["tmp3"], host["tmp4_padded"]
    VUU, KUU = host["VUU_adj"], host["KUU_adj"]
    VUI, KUI = host["VUI_adj"], host["KUI_adj"]

    Nv, NiV = VUI.shape
    Nk = KUU.shape[0]
    nKi, NiK = KUI.shape

    # slice the five similarity blocks out of the single fused matmul
    vi_adj = sims[:Nv, :NiV]                                      # Vuser @ Vitem.T
    vu_adj = sims[:Nv, NiV:NiV + Nv]                              # Vuser @ Vuser.T
    ku_adj = sims[Nv:Nv + Nk, NiV + Nv:NiV + Nv + Nk]             # Kuser @ Kuser.T
    ki_adj = sims[Nv:Nv + nKi,
                  NiV + Nv + Nk:NiV + Nv + Nk + NiK]              # Kuser[:5] @ Kitem.T

    Vu = contrast_loss(VUU, tmp1, vu_adj, vu_adj, seed=seed)
    Ku = contrast_loss(KUU[:Nv, :Nk - 3], tmp2[:Nv, -3:],
                       ku_adj[:Nv, :Nk - 3], ku_adj[:Nv, -3:], seed=seed + 1)
    Vi = contrast_loss(VUI, tmp3, vi_adj, vi_adj, seed=seed + 2)
    Ki = contrast_loss(KUI, tmp4_p[:nKi], ki_adj, ki_adj, seed=seed + 3)
    ii = float(host["ii"])
    return Vu, Ku, Vi, Ki, ii


# ----------------------------------------------------------------------------
# main
# ----------------------------------------------------------------------------

if __name__ == "__main__":
    key = jax.random.PRNGKey(0)
    keys = jax.random.split(key, 12)

    D = 32      # embedding dim
    Nv = 8      # V-domain users
    Nk = 16     # K-domain users (>= Nv, > 3)
    NiV = 8     # V-domain items
    NiK = 8     # K-domain items

    Vuser = jax.random.normal(keys[0], (Nv, D), jnp.float32)
    Vitem = jax.random.normal(keys[1], (NiV, D), jnp.float32)
    Kuser = jax.random.normal(keys[2], (Nk, D), jnp.float32)
    Kitem = jax.random.normal(keys[3], (NiK, D), jnp.float32)
    Vid = jax.random.normal(keys[4], (Nv, D), jnp.float32)   # unused by the forward

    def sparse_pos(k, shape, p=0.5):
        u = jax.random.uniform(k, shape, jnp.float32)
        m = jax.random.uniform(jax.random.fold_in(k, 1), shape) < p
        return jnp.where(m, u, jnp.float32(0.0))

    VUU_adj = sparse_pos(keys[5], (Nv, Nv))
    KUU_adj = sparse_pos(keys[6], (Nk, Nk))
    preference = (jax.random.uniform(keys[7], (NiK, 5)) < 0.5).astype(jnp.float32)
    Vpreference = (jax.random.uniform(keys[8], (NiV, Nv)) < 0.5).astype(jnp.float32)
    structure = jax.random.normal(keys[9], (NiK, NiV), jnp.float32)

    del Vid  # matches the reference forward, which never uses Vid

    # device portion: one jit -> one fused Pallas kernel
    dev = device_forward(KUU_adj, VUU_adj, Vuser, Vitem, Kuser, Kitem,
                         preference, Vpreference, structure)
    dev = jax.block_until_ready(dev)

    # host portion: ONE batched device->host transfer, then the data-dependent
    # sampling loops of contrast_loss in numpy
    Vu, Ku, Vi, Ki, ii = host_losses(jax.device_get(dev), seed=0)

    for name, v in [("Vu", Vu), ("Ku", Ku), ("Vi", Vi), ("Ki", Ki), ("ii", ii)]:
        assert np.isfinite(v), f"{name} is not finite"

    print("KERNEL_OK")
</pallas_src>

<mosaic_0001>
module attributes {stable_mosaic.version = 11 : i64} {
  func.func @kernel(%arg0: i32, %arg1: memref<32x32xf32, #tpu.memory_space<vmem>>, %arg2: memref<128x32xf32, #tpu.memory_space<vmem>>, %arg3: memref<8x8xf32, #tpu.memory_space<vmem>>, %arg4: memref<16x16xf32, #tpu.memory_space<vmem>>, %arg5: memref<8x8xf32, #tpu.memory_space<vmem>>, %arg6: memref<8x8xf32, #tpu.memory_space<vmem>>, %arg7: memref<8x8xf32, #tpu.memory_space<vmem>>, %arg8: memref<32x128xf32, #tpu.memory_space<vmem>>, %arg9: memref<8x8xf32, #tpu.memory_space<vmem>>, %arg10: memref<16x16xf32, #tpu.memory_space<vmem>>, %arg11: memref<8x8xf32, #tpu.memory_space<vmem>>, %arg12: memref<8x8xf32, #tpu.memory_space<vmem>>, %arg13: memref<8x128xf32, #tpu.memory_space<vmem>>) attributes {dimension_semantics = [#tpu.dimension_semantics<arbitrary>], iteration_bounds = array<i64: 1>, scalar_prefetch = 0 : i64, scratch_operands = 0 : i64, tpu.core_type = #tpu.core_type<tc>, window_params = [{pipeline_mode = #tpu.pipeline_mode<synchronous>, transform_indices = @transform_0, window_bounds = array<i64: 32, 32>}, {pipeline_mode = #tpu.pipeline_mode<synchronous>, transform_indices = @transform_1, window_bounds = array<i64: 128, 32>}, {pipeline_mode = #tpu.pipeline_mode<synchronous>, transform_indices = @transform_2, window_bounds = array<i64: 8, 8>}, {pipeline_mode = #tpu.pipeline_mode<synchronous>, transform_indices = @transform_3, window_bounds = array<i64: 16, 16>}, {pipeline_mode = #tpu.pipeline_mode<synchronous>, transform_indices = @transform_4, window_bounds = array<i64: 8, 8>}, {pipeline_mode = #tpu.pipeline_mode<synchronous>, transform_indices = @transform_5, window_bounds = array<i64: 8, 8>}, {pipeline_mode = #tpu.pipeline_mode<synchronous>, transform_indices = @transform_6, window_bounds = array<i64: 8, 8>}, {pipeline_mode = #tpu.pipeline_mode<synchronous>, transform_indices = @transform_7, window_bounds = array<i64: 32, 128>}, {pipeline_mode = #tpu.pipeline_mode<synchronous>, transform_indices = @transform_8, window_bounds = array<i64: 8, 8>}, {pipeline_mode = #tpu.pipeline_mode<synchronous>, transform_indices = @transform_9, window_bounds = array<i64: 16, 16>}, {pipeline_mode = #tpu.pipeline_mode<synchronous>, transform_indices = @transform_10, window_bounds = array<i64: 8, 8>}, {pipeline_mode = #tpu.pipeline_mode<synchronous>, transform_indices = @transform_11, window_bounds = array<i64: 8, 8>}, {pipeline_mode = #tpu.pipeline_mode<synchronous>, transform_indices = @transform_12, window_bounds = array<i64: 8, 128>}]} {
    %c0 = arith.constant 0 : index
    %c0_0 = arith.constant 0 : index
    %0 = vector.load %arg1[%c0, %c0_0] : memref<32x32xf32, #tpu.memory_space<vmem>>, vector<32x32xf32>
    %c0_1 = arith.constant 0 : index
    %c0_2 = arith.constant 0 : index
    %1 = vector.load %arg2[%c0_1, %c0_2] : memref<128x32xf32, #tpu.memory_space<vmem>>, vector<128x32xf32>
    %cst = arith.constant dense<0.000000e+00> : vector<32x128xf32>
    %2 = tpu.matmul %0, %1, %cst {dimension_numbers = #tpu.dot_dimension_numbers<[1], [1], [0], [0], [0, 0, 1, 0], [], []>} : vector<32x32xf32>, vector<128x32xf32>, vector<32x128xf32> -> vector<32x128xf32>
    %c0_3 = arith.constant 0 : index
    %c0_4 = arith.constant 0 : index
    %3 = vector.load %arg8[%c0_3, %c0_4] : memref<32x128xf32, #tpu.memory_space<vmem>>, vector<32x128xf32>
    tpu.vector_store %arg8[%c0_3, %c0_4], %2 {strides = array<i32>} : memref<32x128xf32, #tpu.memory_space<vmem>>, vector<32x128xf32>,
    %c0_5 = arith.constant 0 : index
    %c0_6 = arith.constant 0 : index
    %4 = vector.load %arg3[%c0_5, %c0_6] : memref<8x8xf32, #tpu.memory_space<vmem>>, vector<8x8xf32>
    %cst_7 = arith.constant 0.000000e+00 : f32
    %5 = vector.broadcast %cst_7 : f32 to vector<8x8xf32>
    %6 = arith.cmpf ogt, %4, %5 : vector<8x8xf32>
    %cst_8 = arith.constant 1.000000e+00 : f32
    %cst_9 = arith.constant 0.000000e+00 : f32
    %7 = vector.broadcast %cst_8 : f32 to vector<8x8xf32>
    %8 = vector.broadcast %cst_9 : f32 to vector<8x8xf32>
    %9 = arith.select %6, %7, %8 : vector<8x8xi1>, vector<8x8xf32>
    %10 = tpu.iota {dimensions = array<i32: 0>} : vector<8x8xi32>
    %11 = tpu.iota {dimensions = array<i32: 1>} : vector<8x8xi32>
    %12 = arith.cmpi eq, %10, %11 : vector<8x8xi32>
    %cst_10 = arith.constant 1.000000e+00 : f32
    %cst_11 = arith.constant 0.000000e+00 : f32
    %13 = vector.broadcast %cst_10 : f32 to vector<8x8xf32>
    %14 = vector.broadcast %cst_11 : f32 to vector<8x8xf32>
    %15 = arith.select %12, %13, %14 : vector<8x8xi1>, vector<8x8xf32>
    %cst_12 = arith.constant 1.000000e+00 : f32
    %16 = vector.broadcast %cst_12 : f32 to vector<8x8xf32>
    %17 = arith.subf %16, %9 : vector<8x8xf32>
    %18 = arith.subf %17, %15 : vector<8x8xf32>
    %c0_13 = arith.constant 0 : index
    %c0_14 = arith.constant 0 : index
    %19 = vector.load %arg9[%c0_13, %c0_14] : memref<8x8xf32, #tpu.memory_space<vmem>>, vector<8x8xf32>
    tpu.vector_store %arg9[%c0_13, %c0_14], %18 {strides = array<i32>} : memref<8x8xf32, #tpu.memory_space<vmem>>, vector<8x8xf32>,
    %c0_15 = arith.constant 0 : index
    %c0_16 = arith.constant 0 : index
    %20 = vector.load %arg4[%c0_15, %c0_16] : memref<16x16xf32, #tpu.memory_space<vmem>>, vector<16x16xf32>
    %cst_17 = arith.constant 0.000000e+00 : f32
    %21 = vector.broadcast %cst_17 : f32 to vector<16x16xf32>
    %22 = arith.cmpf ogt, %20, %21 : vector<16x16xf32>
    %cst_18 = arith.constant 1.000000e+00 : f32
    %cst_19 = arith.constant 0.000000e+00 : f32
    %23 = vector.broadcast %cst_18 : f32 to vector<16x16xf32>
    %24 = vector.broadcast %cst_19 : f32 to vector<16x16xf32>
    %25 = arith.select %22, %23, %24 : vector<16x16xi1>, vector<16x16xf32>
    %26 = tpu.iota {dimensions = array<i32: 0>} : vector<16x16xi32>
    %27 = tpu.iota {dimensions = array<i32: 1>} : vector<16x16xi32>
    %28 = arith.cmpi eq, %26, %27 : vector<16x16xi32>
    %cst_20 = arith.constant 1.000000e+00 : f32
    %cst_21 = arith.constant 0.000000e+00 : f32
    %29 = vector.broadcast %cst_20 : f32 to vector<16x16xf32>
    %30 = vector.broadcast %cst_21 : f32 to vector<16x16xf32>
    %31 = arith.select %28, %29, %30 : vector<16x16xi1>, vector<16x16xf32>
    %cst_22 = arith.constant 1.000000e+00 : f32
    %32 = vector.broadcast %cst_22 : f32 to vector<16x16xf32>
    %33 = arith.subf %32, %25 : vector<16x16xf32>
    %34 = arith.subf %33, %31 : vector<16x16xf32>
    %c0_23 = arith.constant 0 : index
    %c0_24 = arith.constant 0 : index
    %35 = vector.load %arg10[%c0_23, %c0_24] : memref<16x16xf32, #tpu.memory_space<vmem>>, vector<16x16xf32>
    tpu.vector_store %arg10[%c0_23, %c0_24], %34 {strides = array<i32>} : memref<16x16xf32, #tpu.memory_space<vmem>>, vector<16x16xf32>,
    %c0_25 = arith.constant 0 : index
    %c0_26 = arith.constant 0 : index
    %36 = vector.load %arg5[%c0_25, %c0_26] : memref<8x8xf32, #tpu.memory_space<vmem>>, vector<8x8xf32>
    %cst_27 = arith.constant 1.000000e+00 : f32
    %37 = vector.broadcast %cst_27 : f32 to vector<8x8xf32>
    %38 = arith.subf %37, %36 : vector<8x8xf32>
    %c0_28 = arith.constant 0 : index
    %c0_29 = arith.constant 0 : index
    %39 = vector.load %arg11[%c0_28, %c0_29] : memref<8x8xf32, #tpu.memory_space<vmem>>, vector<8x8xf32>
    tpu.vector_store %arg11[%c0_28, %c0_29], %38 {strides = array<i32>} : memref<8x8xf32, #tpu.memory_space<vmem>>, vector<8x8xf32>,
    %c0_30 = arith.constant 0 : index
    %c0_31 = arith.constant 0 : index
    %40 = vector.load %arg6[%c0_30, %c0_31] : memref<8x8xf32, #tpu.memory_space<vmem>>, vector<8x8xf32>
    %cst_32 = arith.constant 1.000000e+00 : f32
    %41 = vector.broadcast %cst_32 : f32 to vector<8x8xf32>
    %42 = arith.subf %41, %40 : vector<8x8xf32>
    %c0_33 = arith.constant 0 : index
    %c0_34 = arith.constant 0 : index
    %43 = vector.load %arg12[%c0_33, %c0_34] : memref<8x8xf32, #tpu.memory_space<vmem>>, vector<8x8xf32>
    tpu.vector_store %arg12[%c0_33, %c0_34], %42 {strides = array<i32>} : memref<8x8xf32, #tpu.memory_space<vmem>>, vector<8x8xf32>,
    %44 = vector.extract_strided_slice %2 {offsets = [24, 0], sizes = [8, 8], strides = [1, 1]} : vector<32x128xf32> to vector<8x8xf32>
    %c0_35 = arith.constant 0 : index
    %c0_36 = arith.constant 0 : index
    %45 = vector.load %arg7[%c0_35, %c0_36] : memref<8x8xf32, #tpu.memory_space<vmem>>, vector<8x8xf32>
    %46 = arith.subf %44, %45 : vector<8x8xf32>
    %47 = math.absf %46 : vector<8x8xf32>
    %48 = vector.shape_cast %47 : vector<8x8xf32> to vector<1x8x8xf32>
    %cst_37 = arith.constant dense<0.000000e+00> : vector<1xf32>
    %49 = vector.multi_reduction <add>, %48, %cst_37 [1, 2] : vector<1x8x8xf32> to vector<1xf32>
    %50 = vector.shape_cast %49 : vector<1xf32> to vector<1x1x1xf32>
    %51 = vector.extract %50[0, 0, 0] : f32 from vector<1x1x1xf32>
    %52 = vector.broadcast %51 : f32 to vector<1x1xf32>
    %cst_38 = arith.constant 6.400000e+01 : f32
    %53 = vector.broadcast %cst_38 : f32 to vector<1x1xf32>
    %54 = arith.divf %52, %53 : vector<1x1xf32>
    %55 = vector.shape_cast %54 : vector<1x1xf32> to vector<1x1xf32>
    %56 = vector.broadcast %55 : vector<1x1xf32> to vector<8x128xf32>
    %c0_39 = arith.constant 0 : index
    %c0_40 = arith.constant 0 : index
    %57 = vector.load %arg13[%c0_39, %c0_40] : memref<8x128xf32, #tpu.memory_space<vmem>>, vector<8x128xf32>
    tpu.vector_store %arg13[%c0_39, %c0_40], %56 {strides = array<i32>} : memref<8x128xf32, #tpu.memory_space<vmem>>, vector<8x128xf32>,
    return
  }
  func.func @transform_0(%arg0: i32) -> (i32, i32) {
    %c0_i32 = arith.constant 0 : i32
    %c0_i32_0 = arith.constant 0 : i32
    %c0_i32_1 = arith.constant 0 : i32
    return %c0_i32, %c0_i32_0 : i32, i32
  }
  func.func @transform_1(%arg0: i32) -> (i32, i32) {
    %c0_i32 = arith.constant 0 : i32
    %c0_i32_0 = arith.constant 0 : i32
    %c0_i32_1 = arith.constant 0 : i32
    return %c0_i32, %c0_i32_0 : i32, i32
  }
  func.func @transform_2(%arg0: i32) -> (i32, i32) {
    %c0_i32 = arith.constant 0 : i32
    %c0_i32_0 = arith.constant 0 : i32
    %c0_i32_1 = arith.constant 0 : i32
    return %c0_i32, %c0_i32_0 : i32, i32
  }
  func.func @transform_3(%arg0: i32) -> (i32, i32) {
    %c0_i32 = arith.constant 0 : i32
    %c0_i32_0 = arith.constant 0 : i32
    %c0_i32_1 = arith.constant 0 : i32
    return %c0_i32, %c0_i32_0 : i32, i32
  }
  func.func @transform_4(%arg0: i32) -> (i32, i32) {
    %c0_i32 = arith.constant 0 : i32
    %c0_i32_0 = arith.constant 0 : i32
    %c0_i32_1 = arith.constant 0 : i32
    return %c0_i32, %c0_i32_0 : i32, i32
  }
  func.func @transform_5(%arg0: i32) -> (i32, i32) {
    %c0_i32 = arith.constant 0 : i32
    %c0_i32_0 = arith.constant 0 : i32
    %c0_i32_1 = arith.constant 0 : i32
    return %c0_i32, %c0_i32_0 : i32, i32
  }
  func.func @transform_6(%arg0: i32) -> (i32, i32) {
    %c0_i32 = arith.constant 0 : i32
    %c0_i32_0 = arith.constant 0 : i32
    %c0_i32_1 = arith.constant 0 : i32
    return %c0_i32, %c0_i32_0 : i32, i32
  }
  func.func @transform_7(%arg0: i32) -> (i32, i32) {
    %c0_i32 = arith.constant 0 : i32
    %c0_i32_0 = arith.constant 0 : i32
    %c0_i32_1 = arith.constant 0 : i32
    return %c0_i32, %c0_i32_0 : i32, i32
  }
  func.func @transform_8(%arg0: i32) -> (i32, i32) {
    %c0_i32 = arith.constant 0 : i32
    %c0_i32_0 = arith.constant 0 : i32
    %c0_i32_1 = arith.constant 0 : i32
    return %c0_i32, %c0_i32_0 : i32, i32
  }
  func.func @transform_9(%arg0: i32) -> (i32, i32) {
    %c0_i32 = arith.constant 0 : i32
    %c0_i32_0 = arith.constant 0 : i32
    %c0_i32_1 = arith.constant 0 : i32
    return %c0_i32, %c0_i32_0 : i32, i32
  }
  func.func @transform_10(%arg0: i32) -> (i32, i32) {
    %c0_i32 = arith.constant 0 : i32
    %c0_i32_0 = arith.constant 0 : i32
    %c0_i32_1 = arith.constant 0 : i32
    return %c0_i32, %c0_i32_0 : i32, i32
  }
  func.func @transform_11(%arg0: i32) -> (i32, i32) {
    %c0_i32 = arith.constant 0 : i32
    %c0_i32_0 = arith.constant 0 : i32
    %c0_i32_1 = arith.constant 0 : i32
    return %c0_i32, %c0_i32_0 : i32, i32
  }
  func.func @transform_12(%arg0: i32) -> (i32, i32) {
    %c0_i32 = arith.constant 0 : i32
    %c0_i32_0 = arith.constant 0 : i32
    %c0_i32_1 = arith.constant 0 : i32
    return %c0_i32, %c0_i32_0 : i32, i32
  }
}

</mosaic_0001>

<bundles_post_ra>
// kernel: device_forward.1
= control target key start
LH: loop header
LB: loop body
LE: loop exit
PB: predicated region body
PF: predicated region fallthrough
CT: control target
= control target key end

     0   :  { %18 = vsyncpa [#allocation3], 0  ;;  %s902_s0 = inlined_call_operand.vmem [shape: f32[32,32], index: 0, kind: input, shape index: {}]   ;;  %s903_s1 = inlined_call_operand.vmem [shape: f32[128,32], index: 1, kind: input, shape index: {}]   ;;  %s904_s2 = inlined_call_operand.vmem [shape: f32[8,8], index: 2, kind: input, shape index: {}]   ;;  %s905_s3 = inlined_call_operand.vmem [shape: f32[16,16], index: 3, kind: input, shape index: {}]   ;;  %s906_s4 = inlined_call_operand.vmem [shape: f32[8,8], index: 4, kind: input, shape index: {}]   ;;  %s907_s5 = inlined_call_operand.vmem [shape: f32[8,8], index: 5, kind: input, shape index: {}]   ;;  %s908_s6 = inlined_call_operand.vmem [shape: f32[8,8], index: 6, kind: input, shape index: {}]   ;;  %s909_s7 = inlined_call_operand.hbm [shape: f32[32,128], index: 7, kind: output, shape index: {0}]   ;;  %s910_s8 = inlined_call_operand.hbm [shape: f32[8,8], index: 8, kind: output, shape index: {1}]   ;;  %s911_s9 = inlined_call_operand.hbm [shape: f32[16,16], index: 9, kind: output, shape index: {2}]   ;;  %s912_s10 = inlined_call_operand.hbm [shape: f32[8,8], index: 10, kind: output, shape index: {3}]   ;;  %s913_s11 = inlined_call_operand.hbm [shape: f32[8,8], index: 11, kind: output, shape index: {4}]   ;;  %s914_s12 = inlined_call_operand.vmem [shape: f32[8,128], index: 12, kind: output, shape index: {5}]  }
   0x1   :  { %19 = vsyncpa [#allocation5], 0  ;;  %v39_v0 = vld [vmem:[%s903_s1] sm:$0xff]  ;;  %v40_v1 = vld [vmem:[%s903_s1 + $0x8] sm:$0xff]  ;;  %vm55_vm0 = vcmask 261120  }
   0x2   :  { %v41_v2 = vld [vmem:[%s903_s1 + $0x10] sm:$0xff]  ;;  %v411_v3 = vpack.c.bf16 %v40_v1, %v39_v0  ;;  %vm685_vm1 = vmpackc.low %vm55_vm0, %vm55_vm0  ;;  %v42_v5 = vld [vmem:[%s903_s1 + $0x18] sm:$0xff] }
   0x3   :  { %v417_v6 = vpack.c.bf16 %v42_v5, %v41_v2  ;;  %v37_v7 = vld [vmem:[%s902_s0 + $0x10] sm:$0xff]  ;;  %v43_v8 = vld [vmem:[%s903_s1 + $0x20] sm:$0xff]  ;;  %v44_v9 = vld [vmem:[%s903_s1 + $0x28] sm:$0xff] }
   0x4   :  { %459 = vmatprep.subr.msk.bf16.mxu1 %vm685_vm1, %v411_v3  ;;  %413 = vmatprep.subr.msk.bf16.mxu0 %vm685_vm1, %v411_v3  ;;  %v35_v10 = vld [vmem:[%s902_s0] sm:$0xff] }
   0x5   :  { %467 = vmatpush3.bf16.xpose.msk.msra.mxu1 %vm685_vm1, %v411_v3  ;;  %416 = vmatpush3.bf16.xpose.msk.msra.mxu0 %vm685_vm1, %v411_v3 }
   0x6   :  { %460 = vmatprep.subr.msk.bf16.mxu1 %vm685_vm1, %v417_v6  ;;  %419 = vmatprep.subr.msk.bf16.mxu0 %vm685_vm1, %v417_v6 }
   0x7   :  { %408 = vmatprep.mubr.msk.f32.mxu1 %vm55_vm0, %v37_v7  ;;  %405 = vmatprep.mubr.msk.f32.mxu0 %vm55_vm0, %v35_v10 }
   0x8   :  { %20 = vsyncpa [#allocation8], 0  ;;  %v423_v11 = vpack.c.bf16 %v44_v9, %v43_v8  ;;  %v45_v12 = vld [vmem:[%s903_s1 + $0x30] sm:$0xff]  ;;  %v46_v13 = vld [vmem:[%s903_s1 + $0x38] sm:$0xff]  ;;  %vm216_vm2 = vcmask 64512   ;;  %v208_v36 = vlaneseq  ;;  %v601_v42 = vmov 0.0  }
   0x9   :  { %v429_v14 = vpack.c.bf16 %v46_v13, %v45_v12  ;;  %v47_v15 = vld [vmem:[%s903_s1 + $0x40] sm:$0xff]  ;;  %v48_v16 = vld [vmem:[%s903_s1 + $0x48] sm:$0xff]  ;;  %v49_v18 = vld [vmem:[%s903_s1 + $0x50] sm:$0xff]  ;;  %s602_s14 = smov [#allocation4]   ;;  %s603_s16 = smov [#allocation7]   ;;  %vm231_vm8 = vcmask 130048  }
   0xa   :  { %v435_v17 = vpack.c.bf16 %v48_v16, %v47_v15  ;;  %v50_v19 = vld [vmem:[%s903_s1 + $0x58] sm:$0xff]  ;;  %v51_v21 = vld [vmem:[%s903_s1 + $0x60] sm:$0xff]  ;;  %v52_v22 = vld [vmem:[%s903_s1 + $0x68] sm:$0xff]  ;;  %v209_v38 = vshrl.u32 %v208_v36, 7  ;;  %v211_v39 = vand.u32 127, %v208_v36  ;;  %s275_s15 = sshll.u32 %s602_s14, 4  ;;  %s276_s15 = int_to_ptr.vmem [resolvable:$true] %s275_s15 }
   0xb   :  { %v441_v20 = vpack.c.bf16 %v50_v19, %v49_v18  ;;  %v447_v23 = vpack.c.bf16 %v52_v22, %v51_v21  ;;  %v53_v24 = vld [vmem:[%s903_s1 + $0x70] sm:$0xff]  ;;  %v54_v25 = vld [vmem:[%s903_s1 + $0x78] sm:$0xff]  ;;  %v36_v28 = vld [vmem:[%s902_s0 + $0x8] sm:$0xff]  ;;  %s297_s17 = sshll.u32 %s603_s16, 4  ;;  %p490_p1 = scmp.lt.s32.totalorder %s276_s15, %s276_s15  ;;  %s829_s17 = int_to_ptr.vmem [resolvable:$true] %s297_s17 }
   0xc   :  { %v453_v26 = vpack.c.bf16 %v54_v25, %v53_v24  ;;  %v38_v27 = vld [vmem:[%s902_s0 + $0x18] sm:$0xff]  ;;  %v240_v29 = vld [vmem:[%s908_s6] sm:$0xff]  ;;  %v219_v41 = vld [vmem:[%s905_s3 + $0x8] sm:$0xff]  ;;  %v224_v44 = vadd.s32 8, %v209_v38  ;;  %vm212_vm6 = vcmp.eq.s32.totalorder %v209_v38, %v211_v39 }
   0xd   :  { %468 = vmatpush3.bf16.xpose.msk.msra.mxu1 %vm685_vm1, %v417_v6  ;;  %422 = vmatpush3.bf16.xpose.msk.msra.mxu0 %vm685_vm1, %v417_v6  ;;  %v205_v37 = vld [vmem:[%s904_s2] sm:$0xff]  ;;  %vm221_vm5 = vcmp.gt.f32.partialorder %v219_v41, 0.0  ;;  %v213_v48 = vsel %vm212_vm6, 1.0, %v601_v42 }
   0xe   :  { %461 = vmatprep.subr.msk.bf16.mxu1 %vm685_vm1, %v423_v11  ;;  %425 = vmatprep.subr.msk.bf16.mxu0 %vm685_vm1, %v423_v11  ;;  %vm206_vm3 = vcmp.gt.f32.partialorder %v205_v37, 0.0  ;;  %v218_v40 = vld [vmem:[%s905_s3] sm:$0xff]  ;;  %v223_v47 = vsel %vm221_vm5, 1.0, %v601_v42  ;;  %vm225_vm7 = vcmp.eq.s32.totalorder %v224_v44, %v211_v39 }
   0xf   :  { %v207_v43 = vsel %vm206_vm3, 1.0, %v601_v42  ;;  %vm220_vm4 = vcmp.gt.f32.partialorder %v218_v40, 0.0  ;;  %v234_v50 = vld [vmem:[%s906_s4] sm:$0xff]  ;;  %v228_v51 = vsub.f32 1.0, %v223_v47  ;;  %v226_v53 = vsel %vm225_vm7, 1.0, %v601_v42  ;;  %s485_s4 = scalar_lea.vmem %s276_s15, 128 }
  0x10   :  { %v214_v45 = vsub.f32 1.0, %v207_v43  ;;  %v222_v46 = vsel %vm220_vm4, 1.0, %v601_v42  ;;  %v235_v54 = vsub.f32 1.0, %v234_v50  ;;  %v237_v55 = vld [vmem:[%s907_s5] sm:$0xff]  ;;  %p486_p0 = scmp.ne.s32.totalorder %s276_s15, %s485_s4  ;;  %p491_p2 = scmp.lt.s32.totalorder %s485_s4, %s485_s4 }
  0x11   :  { %v227_v49 = vsub.f32 1.0, %v222_v46  ;;  %v230_v58 = vsub.f32 %v228_v51, %v226_v53  ;;  %v238_v59 = vsub.f32 1.0, %v237_v55 }
  0x12   :  { %v215_v52 = vsub.f32 %v214_v45, %v213_v48  ;;  %236 = vst.msk [vmem:[#allocation7] sm:$0xff] %vm216_vm2, %v235_v54  ;;  %p492_p3 = por %p491_p2, %p490_p1 }
  0x13   :  { %v229_v57 = vsub.f32 %v227_v49, %v213_v48 }
  0x14   :  { %217 = vst.msk [vmem:[#allocation4] sm:$0xff] %vm216_vm2, %v215_v52  ;;  %p493_p4 = pnand %p492_p3, %p486_p0 }
  0x15   :  { %469 = vmatpush3.bf16.xpose.msk.msra.mxu1 %vm685_vm1, %v423_v11  ;;  %428 = vmatpush3.bf16.xpose.msk.msra.mxu0 %vm685_vm1, %v423_v11  ;;  %232 = vst.msk [vmem:[#allocation6] sm:$0xff] %vm231_vm8, %v229_v57 }
  0x16   :  { %462 = vmatprep.subr.msk.bf16.mxu1 %vm685_vm1, %v429_v14  ;;  %431 = vmatprep.subr.msk.bf16.mxu0 %vm685_vm1, %v429_v14 }
  0x1d   :  { %470 = vmatpush3.bf16.xpose.msk.msra.mxu1 %vm685_vm1, %v429_v14  ;;  %434 = vmatpush3.bf16.xpose.msk.msra.mxu0 %vm685_vm1, %v429_v14 }
  0x1e   :  { %463 = vmatprep.subr.msk.bf16.mxu1 %vm685_vm1, %v435_v17  ;;  %437 = vmatprep.subr.msk.bf16.mxu0 %vm685_vm1, %v435_v17 }
  0x25   :  { %471 = vmatpush3.bf16.xpose.msk.msra.mxu1 %vm685_vm1, %v435_v17  ;;  %440 = vmatpush3.bf16.xpose.msk.msra.mxu0 %vm685_vm1, %v435_v17 }
  0x26   :  { %464 = vmatprep.subr.msk.bf16.mxu1 %vm685_vm1, %v441_v20  ;;  %443 = vmatprep.subr.msk.bf16.mxu0 %vm685_vm1, %v441_v20 }
  0x2d   :  { %472 = vmatpush3.bf16.xpose.msk.msra.mxu1 %vm685_vm1, %v441_v20  ;;  %446 = vmatpush3.bf16.xpose.msk.msra.mxu0 %vm685_vm1, %v441_v20 }
  0x2e   :  { %465 = vmatprep.subr.msk.bf16.mxu1 %vm685_vm1, %v447_v23  ;;  %449 = vmatprep.subr.msk.bf16.mxu0 %vm685_vm1, %v447_v23 }
  0x35   :  { %473 = vmatpush3.bf16.xpose.msk.msra.mxu1 %vm685_vm1, %v447_v23  ;;  %452 = vmatpush3.bf16.xpose.msk.msra.mxu0 %vm685_vm1, %v447_v23 }
  0x36   :  { %466 = vmatprep.subr.msk.bf16.mxu1 %vm685_vm1, %v453_v26  ;;  %455 = vmatprep.subr.msk.bf16.mxu0 %vm685_vm1, %v453_v26 }
  0x3d   :  { %474 = vmatpush3.bf16.xpose.msk.msra.mxu1 %vm685_vm1, %v453_v26  ;;  %458 = vmatpush3.bf16.xpose.msk.msra.mxu0 %vm685_vm1, %v453_v26 }
  0x44   :  { %409 = vmatmul.mubr.msk.f32.vlgmr.msra.gmra.mrb[0].mxu1 %vm55_vm0, %v38_v27  ;;  %406 = vmatmul.mubr.msk.f32.vlgmr.msra.gmra.mrb[0].mxu0 %vm55_vm0, %v36_v28 }
 0x117   :  { %v410_v30 = vpop.f32.mrb[0].mxu1  ;;  %v407_v35 = vpop.f32.mrb[0].mxu0 }
 0x118   :  { %204 = vst [vmem:[#allocation2 + $0x18] sm:$0xff] %v410_v30  ;;  %v241_v31 = vsub.f32 %v410_v30, %v240_v29  ;;  %v192_v32 = vpop.f32.mrb[1].mxu1  ;;  %202 = vst [vmem:[#allocation2 + $0x8] sm:$0xff] %v407_v35  ;;  %v182_v56 = vpop.f32.mrb[1].mxu0 }
 0x119   :  { %203 = vst [vmem:[#allocation2 + $0x10] sm:$0xff] %v192_v32  ;;  %201 = vst [vmem:[#allocation2] sm:$0xff] %v182_v56 }
 0x11a   :  { %v242_v33 = vand.u32 2147483647, %v241_v31 }
 0x11c   :  { %v243_v34 = vsel %vm216_vm2, %v242_v33, 0.0 }
 0x11d   :  { %244 = vadd.xlane.f32.xlu0 %v243_v34 }
 0x11e   :  { %496 = shalt.err (!%p493_p4)
}
 0x11f   :  { %s497_s19 = scalar_lea.hbm %s910_s8, 128 }
 0x120   :  { %p498_p5 = scmp.ne.s32.totalorder %s910_s8, %s497_s19  ;;  %p501_p6 = scmp.lt.u32.totalorder %s497_s19, %s910_s8 }
 0x122   :  { %p503_p7 = pnand %p501_p6, %p498_p5 }
 0x124   :  { %506 = shalt.err (!%p503_p7)
}
 0x125   :  { %278 = dma.vmem_to_hbm [thread:$0]  %s276_s15, 128, %s910_s8, [#allocation5]   ;;  %233 = vst.msk [vmem:[#allocation6 + $0x8] sm:$0xff] %vm231_vm8, %v230_v58 }
 0x126   :  { %239 = vst.msk [vmem:[#allocation9] sm:$0xff] %vm216_vm2, %v238_v59  ;;  %s507_s25 = scalar_lea.vmem %s829_s17, 128  ;;  %p512_p9 = scmp.lt.s32.totalorder %s829_s17, %s829_s17 }
 0x127   :  { %p508_p8 = scmp.ne.s32.totalorder %s829_s17, %s507_s25  ;;  %p513_p10 = scmp.lt.s32.totalorder %s507_s25, %s507_s25 }
 0x129   :  { %p514_p11 = por %p513_p10, %p512_p9 }
 0x12b   :  { %p515_p12 = pnand %p514_p11, %p508_p8 }
 0x12d   :  { %518 = shalt.err (!%p515_p12)
}
 0x12e   :  { %s519_s6 = scalar_lea.hbm %s912_s10, 128 }
 0x12f   :  { %p520_p13 = scmp.ne.s32.totalorder %s912_s10, %s519_s6  ;;  %p523_p0 = scmp.lt.u32.totalorder %s519_s6, %s912_s10 }
 0x131   :  { %p525_p1 = pnand %p523_p0, %p520_p13 }
 0x133   :  { %528 = shalt.err (!%p525_p1)
}
 0x134   :  { %300 = dma.vmem_to_hbm [thread:$0]  %s829_s17, 128, %s912_s10, [#allocation8]  }
 0x135   :  { %s604_s3 = smov [#allocation2]  }
 0x136   :  { %s262_s13 = sshll.u32 %s604_s3, 4  ;;  %s263_s13 = int_to_ptr.vmem [resolvable:$true] %s262_s13 }
 0x137   :  { %s529_s14 = scalar_lea.vmem %s263_s13, 512  ;;  %p534_p3 = scmp.lt.s32.totalorder %s263_s13, %s263_s13 }
 0x138   :  { %p530_p2 = scmp.ne.s32.totalorder %s263_s13, %s529_s14  ;;  %p535_p4 = scmp.lt.s32.totalorder %s529_s14, %s529_s14 }
 0x13a   :  { %p536_p5 = por %p535_p4, %p534_p3 }
 0x13c   :  { %p537_p6 = pnand %p536_p5, %p530_p2 }
 0x13e   :  { %540 = shalt.err (!%p537_p6)
}
 0x13f   :  { %s541_s4 = scalar_lea.hbm %s909_s7, 512 }
 0x140   :  { %p542_p7 = scmp.ne.s32.totalorder %s909_s7, %s541_s4  ;;  %p545_p8 = scmp.lt.u32.totalorder %s541_s4, %s909_s7 }
 0x142   :  { %p547_p9 = pnand %p545_p8, %p542_p7 }
 0x144   :  { %550 = shalt.err (!%p547_p9)
}
 0x145   :  { %s605_s17 = smov 128   ;;  %s606_s20 = smov 8  }
 0x146   :  { %268 = dma.vmem_to_hbm [thread:$0]  %s263_s13, 512, %s909_s7, [#allocation3], %s605_s17, %s605_s17, %s606_s20  }
 0x147   :  { %s607_s22 = smov [#allocation6]   ;;  %s608_s24 = smov [#allocation9]  }
 0x148   :  { %s284_s23 = sshll.u32 %s607_s22, 4  ;;  %s307_s25 = sshll.u32 %s608_s24, 4  ;;  %s285_s23 = int_to_ptr.vmem [resolvable:$true] %s284_s23  ;;  %s308_s25 = int_to_ptr.vmem [resolvable:$true] %s307_s25 }
 0x149   :  { %s551_s0 = scalar_lea.vmem %s285_s23, 256  ;;  %p556_p11 = scmp.lt.s32.totalorder %s285_s23, %s285_s23 }
 0x14a   :  { %p552_p10 = scmp.ne.s32.totalorder %s285_s23, %s551_s0  ;;  %p557_p12 = scmp.lt.s32.totalorder %s551_s0, %s551_s0 }
 0x14c   :  { %p558_p13 = por %p557_p12, %p556_p11 }
 0x14e   :  { %p559_p0 = pnand %p558_p13, %p552_p10 }
 0x150   :  { %562 = shalt.err (!%p559_p0)
}
 0x151   :  { %s563_s27 = scalar_lea.hbm %s911_s9, 256 }
 0x152   :  { %p564_p1 = scmp.ne.s32.totalorder %s911_s9, %s563_s27  ;;  %p567_p2 = scmp.lt.u32.totalorder %s563_s27, %s911_s9 }
 0x154   :  { %p569_p3 = pnand %p567_p2, %p564_p1 }
 0x156   :  { %572 = shalt.err (!%p569_p3)
}
 0x157   :  { %290 = dma.vmem_to_hbm [thread:$0]  %s285_s23, 256, %s911_s9, [#allocation5], %s605_s17, %s605_s17, %s606_s20  }
 0x158   :  { %s573_s3 = scalar_lea.vmem %s308_s25, 128  ;;  %p578_p5 = scmp.lt.s32.totalorder %s308_s25, %s308_s25 }
 0x159   :  { %p574_p4 = scmp.ne.s32.totalorder %s308_s25, %s573_s3  ;;  %p579_p6 = scmp.lt.s32.totalorder %s573_s3, %s573_s3 }
 0x15b   :  { %p580_p7 = por %p579_p6, %p578_p5 }
 0x15d   :  { %p581_p8 = pnand %p580_p7, %p574_p4 }
 0x15f   :  { %584 = shalt.err (!%p581_p8)
}
 0x160   :  { %s585_s15 = scalar_lea.hbm %s913_s11, 128 }
 0x161   :  { %p586_p9 = scmp.ne.s32.totalorder %s913_s11, %s585_s15  ;;  %p589_p10 = scmp.lt.u32.totalorder %s585_s15, %s913_s11 }
 0x163   :  { %p591_p11 = pnand %p589_p10, %p586_p9 }
 0x165   :  { %594 = shalt.err (!%p591_p11)
}
 0x166   :  { %310 = dma.vmem_to_hbm [thread:$0]  %s308_s25, 128, %s913_s11, [#allocation8]  }
 0x1aa   :  { %v245_v60 = vpop.xlane.xlu0 %244 }
 0x1ab   :  { %v246_v61 = vrot.slane %v245_v60, 4 }
 0x1ad   :  { %v247_v62 = vadd.f32 %v246_v61, %v245_v60 }
 0x1af   :  { %v248_v63 = vrot.slane %v247_v62, 2 }
 0x1b1   :  { %v249_v0 = vadd.f32 %v248_v63, %v247_v62 }
 0x1b3   :  { %v250_v1 = vrot.slane %v249_v0, 1 }
 0x1b5   :  { %v251_v2 = vadd.f32 %v250_v1, %v249_v0 }
 0x1b7   :  { %475 = vpush %v251_v2 }
 0x1e8   :  { %s476_s10 = spop %475 }
 0x1e9   :  { %v253_v3 = vstv %s476_s10 }
 0x1ea   :  { %v255_v4 = vmul.f32 0.015625, %v253_v3 }
 0x1ec   :  { %256 = vst [vmem:[%s914_s12] sm:$0xff] %v255_v4 }
 0x1ed   :  { %595 = dma.done.wait [#allocation3], 512  }
 0x1ee   :  { %596 = vsyncadd [#allocation3], 4294966784 }
 0x1ef   :  { %597 = dma.done.wait [#allocation5], 384  }
 0x1f0   :  { %598 = vsyncadd [#allocation5], 4294966912 }
 0x1f1   :  { %599 = dma.done.wait [#allocation8], 256  }
 0x1f2   :  { %600 = vsyncadd [#allocation8], 4294967040 }
 0x1f3   :  { %330 = vsyncpa [#allocation3], 1 }
 0x1f4   :  { %331 = vsyncpa [#allocation5], 1 }
 0x1f5   :  { %332 = vsyncpa [#allocation8], 1 }

</bundles_post_ra>
